<compile_context>
chip_gen: v5e
topology: v5e:2x2
jax: 0.10.0
libtpu: 0.0.40
codegen_flags: <defaults>
</compile_context>

<pallas_src>
import jax
import jax.numpy as jnp
from jax.experimental import pallas as pl
from jax.experimental.pallas import tpu as pltpu


# ----------------------------- Pallas kernel ---------------------------------
def sparse_tsf_kernel(x_ref, w_ref, o_ref):
    # x_ref: (R, seq_len)  -- R = batch * kept_channels, de-mean rows here
    # w_ref: (seq_len, pred_len) fused (conv-residual o segment-linear) matrix
    # o_ref: (R, pred_len)
    x = x_ref[...]                                           # (R, S)
    seq_mean = jnp.mean(x, axis=1, keepdims=True)            # (R, 1)
    xc = x - seq_mean                                        # de-meaned
    y = jnp.dot(xc, w_ref[...],
                preferred_element_type=jnp.float32)          # (R, P) single MXU matmul
    o_ref[...] = y + seq_mean                                # mean add-back, no transpose


# ------------------------------ wrapper (glue) --------------------------------
def sparse_tsf_forward(x, conv_w, lin_w, *, seq_len, pred_len, enc_in, period_len):
    """x: (B, 1, enc_in, seq_len) float32. Returns (B, pred_len, 3)."""
    B = x.shape[0]
    C = 3  # the module only emits channels 0:3

    # Only the channels that survive the final slice are computed.
    x3 = x[:, 0, 0:C, :].astype(jnp.float32)                 # (B, C, S)
    x_flat = x3.reshape(B * C, seq_len)                      # (R, S)

    # conv1d(kernel K, same padding, no bias) as (seq_len, seq_len) band matrix:
    #   out[t] = sum_s x[s] * w[s - t + pad]
    K = conv_w.shape[-1]
    pad = period_len // 2
    w = conv_w.reshape(K).astype(jnp.float32)
    s_idx = jnp.arange(seq_len)[:, None]
    t_idx = jnp.arange(seq_len)[None, :]
    tap = s_idx - t_idx + pad
    conv_mat = jnp.where((tap >= 0) & (tap < K),
                         w[jnp.clip(tap, 0, K - 1)],
                         0.0).astype(jnp.float32)            # (S, S)

    # segment-wise linear (seg_num_x -> seg_num_y) as (seq_len, pred_len) matrix
    lin_mat = jnp.kron(lin_w.T.astype(jnp.float32),
                       jnp.eye(period_len, dtype=jnp.float32))  # (S, P)

    # Fuse conv-residual + segment linear:  y = xc @ (conv + I) @ lin
    combined = conv_mat @ lin_mat + lin_mat                  # (S, P)

    R = B * C
    out_flat = pl.pallas_call(
        sparse_tsf_kernel,
        out_shape=jax.ShapeDtypeStruct((R, pred_len), jnp.float32),
        in_specs=[
            pl.BlockSpec((R, seq_len), lambda: (0, 0)),
            pl.BlockSpec((seq_len, pred_len), lambda: (0, 0)),
        ],
        out_specs=pl.BlockSpec((R, pred_len), lambda: (0, 0)),
    )(x_flat, combined)

    # Back to the module's (B, pred_len, 3) layout outside the kernel.
    return jnp.transpose(out_flat.reshape(B, C, pred_len), (0, 2, 1))


# --------------------------- pure-JAX reference --------------------------------
def sparse_tsf_reference(x, conv_w, lin_w, *, seq_len, pred_len, enc_in, period_len):
    B = x.shape[0]
    seg_num_x = seq_len // period_len
    pad = period_len // 2
    xs = x[:, 0]                                             # (B, E, S)
    xp = jnp.transpose(xs, (0, 2, 1))                        # (B, S, E)
    seq_mean = jnp.mean(xp, axis=1, keepdims=True)           # (B, 1, E)
    xc = jnp.transpose(xp - seq_mean, (0, 2, 1))             # (B, E, S)
    xin = xc.reshape(B * enc_in, 1, seq_len)
    conv = jax.lax.conv_general_dilated(
        xin, conv_w, window_strides=(1,), padding=[(pad, pad)],
        dimension_numbers=("NCH", "OIH", "NCH"))
    xr = conv.reshape(B, enc_in, seq_len) + xc
    seg = xr.reshape(B * enc_in, seg_num_x, period_len).transpose(0, 2, 1)
    y = seg @ lin_w.T                                        # (BE, period, seg_y)
    y = y.transpose(0, 2, 1).reshape(B, enc_in, pred_len)
    y = jnp.transpose(y, (0, 2, 1)) + seq_mean
    return y[:, :, 0:3]


# ----------------------------------- main --------------------------------------
if __name__ == "__main__":
    # config (small, consistent with the module's constraints)
    seq_len, pred_len, enc_in, period_len = 16, 8, 8, 4
    seg_num_x = seq_len // period_len       # 4
    seg_num_y = pred_len // period_len      # 2
    K = 1 + 2 * (period_len // 2)           # conv kernel size = 5
    B = 2

    key = jax.random.PRNGKey(0)
    k_x, k_conv, k_lin = jax.random.split(key, 3)

    # input: (batch, 1, enc_in, seq_len)
    x = jax.random.normal(k_x, (B, 1, enc_in, seq_len), dtype=jnp.float32)

    # deterministic parameter init (PyTorch-like uniform bounds)
    conv_bound = 1.0 / (K ** 0.5)
    conv_w = jax.random.uniform(k_conv, (1, 1, K), jnp.float32,
                                -conv_bound, conv_bound)
    lin_bound = 1.0 / (seg_num_x ** 0.5)
    lin_w = jax.random.uniform(k_lin, (seg_num_y, seg_num_x), jnp.float32,
                               -lin_bound, lin_bound)

    out = sparse_tsf_forward(x, conv_w, lin_w, seq_len=seq_len,
                             pred_len=pred_len, enc_in=enc_in,
                             period_len=period_len)
    out = jax.block_until_ready(out)

    ref = sparse_tsf_reference(x, conv_w, lin_w, seq_len=seq_len,
                               pred_len=pred_len, enc_in=enc_in,
                               period_len=period_len)
    assert out.shape == (B, pred_len, 3), out.shape
    assert jnp.allclose(out, ref, atol=2e-5, rtol=2e-5), \
        float(jnp.max(jnp.abs(out - ref)))

    print("KERNEL_OK")
</pallas_src>

<mosaic_0001>
module attributes {stable_mosaic.version = 11 : i64} {
  func.func @sparse_tsf_kernel(%arg0: memref<6x16xf32, #tpu.memory_space<vmem>>, %arg1: memref<16x8xf32, #tpu.memory_space<vmem>>, %arg2: memref<6x8xf32, #tpu.memory_space<vmem>>) attributes {dimension_semantics = [], scalar_prefetch = 0 : i64, scratch_operands = 0 : i64, tpu.core_type = #tpu.core_type<tc>} {
    %c0 = arith.constant 0 : index
    %c0_0 = arith.constant 0 : index
    %0 = vector.load %arg0[%c0, %c0_0] : memref<6x16xf32, #tpu.memory_space<vmem>>, vector<6x16xf32>
    %cst = arith.constant dense<0.000000e+00> : vector<6xf32>
    %1 = vector.multi_reduction <add>, %0, %cst [1] : vector<6x16xf32> to vector<6xf32>
    %2 = vector.shape_cast %1 : vector<6xf32> to vector<6x1xf32>
    %cst_1 = arith.constant 1.600000e+01 : f32
    %3 = vector.broadcast %cst_1 : f32 to vector<6x1xf32>
    %4 = arith.divf %2, %3 : vector<6x1xf32>
    %5 = vector.broadcast %4 : vector<6x1xf32> to vector<6x16xf32>
    %6 = arith.subf %0, %5 : vector<6x16xf32>
    %c0_2 = arith.constant 0 : index
    %c0_3 = arith.constant 0 : index
    %7 = vector.load %arg1[%c0_2, %c0_3] : memref<16x8xf32, #tpu.memory_space<vmem>>, vector<16x8xf32>
    %cst_4 = arith.constant dense<0.000000e+00> : vector<6x8xf32>
    %8 = tpu.matmul %6, %7, %cst_4 {dimension_numbers = #tpu.dot_dimension_numbers<[1], [0], [0], [1], [0, 0, 1, 1], [], []>} : vector<6x16xf32>, vector<16x8xf32>, vector<6x8xf32> -> vector<6x8xf32>
    %9 = vector.broadcast %4 : vector<6x1xf32> to vector<6x8xf32>
    %10 = arith.addf %8, %9 : vector<6x8xf32>
    %c0_5 = arith.constant 0 : index
    %c0_6 = arith.constant 0 : index
    %11 = vector.load %arg2[%c0_5, %c0_6] : memref<6x8xf32, #tpu.memory_space<vmem>>, vector<6x8xf32>
    tpu.vector_store %arg2[%c0_5, %c0_6], %10 {strides = array<i32>} : memref<6x8xf32, #tpu.memory_space<vmem>>, vector<6x8xf32>,
    return
  }
}

</mosaic_0001>

<bundles_post_ra>
// kernel: tpu_custom_call.1
= control target key start
LH: loop header
LB: loop body
LE: loop exit
PB: predicated region body
PF: predicated region fallthrough
CT: control target
= control target key end

     0   :  { %vm13_vm0 = vcmask 128000   ;;  %s130_s0 = inlined_call_operand.vmem [shape: f32[6,16], index: 0, kind: input, shape index: {}]   ;;  %s131_s1 = inlined_call_operand.vmem [shape: f32[16,8], index: 1, kind: input, shape index: {}]   ;;  %s132_s2 = inlined_call_operand.hbm [shape: f32[6,8], index: 2, kind: output, shape index: {}]  }
   0x1   :  { %v12_v0 = vld [vmem:[%s130_s0] sm:$0x3f] }
   0x2   :  { %7 = vsyncpa [#allocation3], 0  ;;  %v14_v1 = vsel %vm13_vm0, %v12_v0, 0.0  ;;  %v27_v2 = vld [vmem:[%s131_s1 + $0x8] sm:$0xff]  ;;  %v26_v3 = vld [vmem:[%s131_s1] sm:$0xff]  ;;  %v101_v4 = vmov 16.0  }
   0x3   :  { %15 = vadd.xlane.f32.xlu0 %v14_v1  ;;  %46 = vmatpush.msra.mxu0 %v27_v2  ;;  %73 = vrcp.f32 %v101_v4  ;;  %vm28_vm2 = vcmask 130048   ;;  %s102_s0 = smov [#allocation2]   ;;  %s61_s1 = sshll.u32 %s132_s2, 4  ;;  %vm52_vm3 = vcmask 62464   ;;  %s62_s1 = int_to_ptr.hbm [resolvable:$true] %s61_s1 }
   0x4   :  { %s59_s15 = sshll.u32 %s102_s0, 4  ;;  %s60_s15 = int_to_ptr.vmem [resolvable:$true] %s59_s15 }
   0x5   :  { %47 = vmatpush.msra.mxu0 %v26_v3 }
   0x9   :  { %v74_v5 = vpop.eup %73 }
   0xa   :  { %v18_v6 = vmul.f32 16.0, %v74_v5  ;;  %vm22_vm1 = vweird.f32 %v74_v5 }
   0xc   :  { %v19_v7 = vsub.f32 1.0, %v18_v6 }
   0xe   :  { %v20_v8 = vmul.f32 %v74_v5, %v19_v7 }
  0x10   :  { %v21_v9 = vadd.f32 %v74_v5, %v20_v8 }
  0x12   :  { %v23_v10 = vsel %vm22_vm1, %v74_v5, %v21_v9 }
  0x76   :  { %v16_v11 = vpop.xlane.xlu0 %15 }
  0x77   :  { %v24_v12 = vmul.f32 %v23_v10, %v16_v11 }
  0x79   :  { %v25_v13 = vsub.f32 %v12_v0, %v24_v12 }
  0x7b   :  { %70 = vmatmul.msk.f32.vlgmr.msra.gmra.mxu0 %vm28_vm2, %v25_v13 }
  0xf8   :  { %v49_v14 = vpop.f32.mrf.mxu0 }
  0xf9   :  { %v50_v15 = vadd.f32 %v49_v14, %v24_v12 }
  0xfb   :  { %53 = vst.msk [vmem:[#allocation2] sm:$0x3f] %vm52_vm3, %v50_v15 }
  0xfc   :  { %64 = dma.vmem_to_hbm [thread:$0]  %s60_s15, 128, %s62_s1, [#allocation3]  }
  0xfd   :  { %99 = dma.done.wait [#allocation3], 128  }
  0xfe   :  { %100 = vsyncadd [#allocation3], 4294967168 }
  0xff   :  { %69 = vsyncpa [#allocation3], 1 }

</bundles_post_ra>
